<compile_context>
chip_gen: v7x
topology: tpu7x:2x2x1
jax: 0.10.0
libtpu: 0.0.40
codegen_flags: <defaults>
</compile_context>

<pallas_src>
import functools

import jax
import jax.numpy as jnp
from jax.experimental import pallas as pl
from jax.experimental.pallas import tpu as pltpu

_VMEM_LIMIT_BYTES = 48 * 1024 * 1024


def _round_up(x, m):
    return ((x + m - 1) // m) * m


# ----------------------------------------------------------------------------
# Label-smoothed NLL: online-LSE, tiled over (row_tiles, vocab_tiles)
# ----------------------------------------------------------------------------
def _make_nll_kernel(eps, n_true, v_true, tn, tv, n_col_tiles, mask_rows, mask_cols):
    def kernel(logits_ref, tgt_ref, out_ref, m_ref, l_ref, s_ref, t_ref):
        k = pl.program_id(1)

        @pl.when(k == 0)
        def _():
            m_ref[...] = jnp.full_like(m_ref, -jnp.inf)
            l_ref[...] = jnp.zeros_like(l_ref)
            s_ref[...] = jnp.zeros_like(s_ref)
            t_ref[...] = jnp.zeros_like(t_ref)

        x = logits_ref[...].astype(jnp.float32)                       # (TN, TV)
        col = jax.lax.broadcasted_iota(jnp.int32, (tn, tv), 1) + k * tv  # global cols

        if mask_cols:
            valid = col < v_true
            x_max = jnp.where(valid, x, -jnp.inf)   # padded cols -> exp() == 0
            x_sum = jnp.where(valid, x, 0.0)        # padded cols -> no S contribution
        else:
            x_max = x
            x_sum = x

        # online log-sum-exp update
        m_prev = m_ref[...]
        m_new = jnp.maximum(m_prev, jnp.max(x_max, axis=-1, keepdims=True))
        p = jnp.exp(x_max - m_new)
        l_ref[...] = l_ref[...] * jnp.exp(m_prev - m_new) + jnp.sum(p, axis=-1, keepdims=True)
        m_ref[...] = m_new

        # running sum of logits (for the smoothing term)
        s_ref[...] = s_ref[...] + jnp.sum(x_sum, axis=-1, keepdims=True)

        # target logit: exactly one global column matches per row (no dense one-hot)
        hit = jnp.where(col == tgt_ref[...], x, 0.0)
        t_ref[...] = t_ref[...] + jnp.sum(hit, axis=-1, keepdims=True)

        @pl.when(k == n_col_tiles - 1)
        def _():
            lse = m_ref[...] + jnp.log(l_ref[...])
            # fused: (1-eps)*(lse - t) + (eps/V)*(V*lse - S)
            per_row = lse - (1.0 - eps) * t_ref[...] - (eps / v_true) * s_ref[...]
            if mask_rows:
                row = (jax.lax.broadcasted_iota(jnp.int32, (tn, 1), 0)
                       + pl.program_id(0) * tn)
                per_row = jnp.where(row < n_true, per_row, 0.0)
            out_ref[...] = per_row

    return kernel


def label_smoothed_nll_loss(logits, targets, eps=0.1, row_tile=256, vocab_tile=2048):
    """logits: (N, V) float (f32 or bf16); targets: (N,) int32.  Returns scalar f32."""
    n, v = logits.shape

    # vocab tiling (lane axis): full V if small, else 2048-wide (multiple of 128)
    if v <= vocab_tile:
        tv, v_pad = v, v
    else:
        tv = vocab_tile
        v_pad = _round_up(v, tv)

    # row tiling (sublane axis): multiple of 8
    if n <= row_tile:
        tn = _round_up(n, 8)
        n_pad = tn
    else:
        tn = row_tile
        n_pad = _round_up(n, tn)

    tgt2d = targets.reshape(n, 1).astype(jnp.int32)
    if (n_pad, v_pad) != (n, v):
        logits = jnp.pad(logits, ((0, n_pad - n), (0, v_pad - v)))
    if n_pad != n:
        tgt2d = jnp.pad(tgt2d, ((0, n_pad - n), (0, 0)))

    n_row_tiles = n_pad // tn
    n_col_tiles = v_pad // tv

    kernel = _make_nll_kernel(
        eps=float(eps), n_true=n, v_true=v, tn=tn, tv=tv,
        n_col_tiles=n_col_tiles,
        mask_rows=(n_pad != n), mask_cols=(v_pad != v))

    per_row = pl.pallas_call(
        kernel,
        out_shape=jax.ShapeDtypeStruct((n_pad, 1), jnp.float32),
        grid=(n_row_tiles, n_col_tiles),
        in_specs=[
            pl.BlockSpec((tn, tv), lambda i, k: (i, k)),
            pl.BlockSpec((tn, 1), lambda i, k: (i, 0)),
        ],
        out_specs=pl.BlockSpec((tn, 1), lambda i, k: (i, 0)),
        scratch_shapes=[pltpu.VMEM((tn, 1), jnp.float32)] * 4,  # m, l, S, t
        compiler_params=pltpu.CompilerParams(
            dimension_semantics=("parallel", "arbitrary"),
            vmem_limit_bytes=_VMEM_LIMIT_BYTES),
    )(logits, tgt2d)

    return jnp.sum(per_row)  # padded rows are zeroed inside the kernel


# ----------------------------------------------------------------------------
# MSE: row-tiled, per-row partial sums
# ----------------------------------------------------------------------------
def _mse_kernel(pred_ref, tgt_ref, out_ref):
    d = pred_ref[...].astype(jnp.float32) - tgt_ref[...].astype(jnp.float32)
    out_ref[...] = jnp.sum(d * d, axis=-1, keepdims=True)


def mse_loss(pred, tgt, row_tile=512):
    """pred, tgt: (N, D) (f32 or bf16).  Returns scalar f32 (sum of squared errors)."""
    n, d = pred.shape
    if n <= row_tile:
        tn = _round_up(n, 8)
        n_pad = tn
    else:
        tn = row_tile
        n_pad = _round_up(n, tn)

    if n_pad != n:
        pred = jnp.pad(pred, ((0, n_pad - n), (0, 0)))  # zero pad -> zero contribution
        tgt = jnp.pad(tgt, ((0, n_pad - n), (0, 0)))

    per_row = pl.pallas_call(
        _mse_kernel,
        out_shape=jax.ShapeDtypeStruct((n_pad, 1), jnp.float32),
        grid=(n_pad // tn,),
        in_specs=[
            pl.BlockSpec((tn, d), lambda i: (i, 0)),
            pl.BlockSpec((tn, d), lambda i: (i, 0)),
        ],
        out_specs=pl.BlockSpec((tn, 1), lambda i: (i, 0)),
        compiler_params=pltpu.CompilerParams(
            dimension_semantics=("parallel",),
            vmem_limit_bytes=_VMEM_LIMIT_BYTES),
    )(pred, tgt)

    return jnp.sum(per_row)


# ----------------------------------------------------------------------------
# Criterion objects (each exposes `_compute_loss(**kwargs)`)
# ----------------------------------------------------------------------------
class LabelSmoothedCECriterion:
    def __init__(self, eps=0.1):
        self.eps = eps

    def _compute_loss(self, logits=None, targets=None, update=True, **kwargs):
        return label_smoothed_nll_loss(logits, targets, eps=self.eps)


class MSECriterion:
    def _compute_loss(self, pred=None, tgt=None, update=True, **kwargs):
        return mse_loss(pred, tgt)


# ----------------------------------------------------------------------------
# MultiCriterion container (mirrors the PyTorch module's forward semantics)
# ----------------------------------------------------------------------------
class MultiCriterion:
    def __init__(self, weights=None, **named_criterions):
        named_criterions = {k: v for k, v in named_criterions.items() if v is not None}
        for name, criterion in named_criterions.items():
            assert hasattr(criterion, "_compute_loss"), \
                '{} ({}) must have method "_compute_loss"'.format(criterion, name)
        self.criterions = dict(named_criterions)
        self.num_criterions = len(self.criterions)
        self.names = list(named_criterions.keys())
        self.weights = weights if weights is not None else {n: 1.0 for n in self.names}

    def add(self, name, criterion, weight=None):
        assert hasattr(criterion, "_compute_loss")
        self.names.append(name)
        self.criterions[name] = criterion
        self.weights[name] = 1.0 if weight is None else weight

    def compute_loss(self, **named_states):
        losses = dict()
        list_losses = []
        for name, criterion in self.criterions.items():
            if named_states[name] is None:
                loss = jnp.asarray(0.0, dtype=jnp.float32)
            else:
                loss = criterion._compute_loss(**named_states[name])
            losses[name] = loss
            if named_states[name] is not None and named_states[name]["update"] is True:
                list_losses.append(self.weights[name] * loss)
        losses["loss"] = sum(list_losses) if list_losses else jnp.asarray(0.0, jnp.float32)
        return losses

    def forward(self, normalization=1.0, reduce=True, **named_states):
        losses = self.compute_loss(**named_states)
        for kk in losses:
            losses[kk] = losses[kk] / normalization
            if reduce:
                losses[kk] = jnp.sum(losses[kk])
        return losses

    __call__ = forward


# ----------------------------------------------------------------------------
# main
# ----------------------------------------------------------------------------
if __name__ == "__main__":
    key = jax.random.PRNGKey(0)
    k1, k2, k3, k4 = jax.random.split(key, 4)

    # small shapes: batch=2, seq=8, vocab=32, hidden=32  -> N = 16 rows
    B, T, V, D = 2, 8, 32, 32
    N = B * T

    # keep inputs bf16 in HBM (both kernels are memory-bound); kernels upcast to f32
    logits = jax.random.normal(k1, (N, V), dtype=jnp.float32).astype(jnp.bfloat16)
    targets = jax.random.randint(k2, (N,), 0, V, dtype=jnp.int32)
    pred = jax.random.normal(k3, (N, D), dtype=jnp.float32).astype(jnp.bfloat16)
    tgt = jax.random.normal(k4, (N, D), dtype=jnp.float32).astype(jnp.bfloat16)

    multi = MultiCriterion(
        weights={"nll": 1.0, "mse": 0.5},
        nll=LabelSmoothedCECriterion(eps=0.1),
        mse=MSECriterion(),
    )

    named_states = {
        "nll": {"logits": logits, "targets": targets, "update": True},
        "mse": {"pred": pred, "tgt": tgt, "update": True},
    }

    losses = multi(normalization=float(N), reduce=True, **named_states)
    jax.block_until_ready(losses["loss"])

    # sanity-check against a plain-JAX reference (same bf16 values, f32 math)
    logits32 = logits.astype(jnp.float32)
    logp = jax.nn.log_softmax(logits32, axis=-1)
    nll_ref = -jnp.take_along_axis(logp, targets[:, None], axis=-1)[:, 0]
    smooth_ref = -jnp.sum(logp, axis=-1)
    eps = 0.1
    nll_total = jnp.sum((1.0 - eps) * nll_ref + (eps / V) * smooth_ref)
    mse_total = jnp.sum((pred.astype(jnp.float32) - tgt.astype(jnp.float32)) ** 2)
    ref_loss = (1.0 * nll_total + 0.5 * mse_total) / N

    assert jnp.allclose(losses["nll"], nll_total / N, rtol=1e-4, atol=1e-4)
    assert jnp.allclose(losses["mse"], mse_total / N, rtol=1e-4, atol=1e-4)
    assert jnp.allclose(losses["loss"], ref_loss, rtol=1e-4, atol=1e-4)

    print("KERNEL_OK")
</pallas_src>

<mosaic_0001>
module attributes {stable_mosaic.version = 11 : i64} {
  func.func @kernel(%arg0: i32, %arg1: i32, %arg2: memref<16x32xbf16, #tpu.memory_space<vmem>>, %arg3: memref<16x1xi32, #tpu.memory_space<vmem>>, %arg4: memref<16x1xf32, #tpu.memory_space<vmem>>, %arg5: memref<16x1xf32, #tpu.memory_space<vmem>>, %arg6: memref<16x1xf32, #tpu.memory_space<vmem>>, %arg7: memref<16x1xf32, #tpu.memory_space<vmem>>, %arg8: memref<16x1xf32, #tpu.memory_space<vmem>>) attributes {dimension_semantics = [#tpu.dimension_semantics<parallel>, #tpu.dimension_semantics<arbitrary>], iteration_bounds = array<i64: 1, 1>, scalar_prefetch = 0 : i64, scratch_operands = 4 : i64, tpu.core_type = #tpu.core_type<tc>, window_params = [{transform_indices = @transform_0, window_bounds = array<i64: 16, 32>}, {transform_indices = @transform_1, window_bounds = array<i64: 16, 1>}, {transform_indices = @transform_2, window_bounds = array<i64: 16, 1>}]} {
    %c0_i32 = arith.constant 0 : i32
    %0 = arith.cmpi eq, %arg1, %c0_i32 : i32
    %1 = arith.extui %0 : i1 to i32
    %c0_i32_0 = arith.constant 0 : i32
    %2 = arith.cmpi ne, %1, %c0_i32_0 : i32
    scf.if %2 {
      %cst_26 = arith.constant 0xFF800000 : f32
      %43 = vector.broadcast %cst_26 : f32 to vector<16x1xf32>
      %c0_27 = arith.constant 0 : index
      %c0_28 = arith.constant 0 : index
      %44 = vector.load %arg5[%c0_27, %c0_28] : memref<16x1xf32, #tpu.memory_space<vmem>>, vector<16x1xf32>
      tpu.vector_store %arg5[%c0_27, %c0_28], %43 {strides = array<i32>} : memref<16x1xf32, #tpu.memory_space<vmem>>, vector<16x1xf32>,
      %cst_29 = arith.constant 0.000000e+00 : f32
      %45 = vector.broadcast %cst_29 : f32 to vector<16x1xf32>
      %c0_30 = arith.constant 0 : index
      %c0_31 = arith.constant 0 : index
      %46 = vector.load %arg6[%c0_30, %c0_31] : memref<16x1xf32, #tpu.memory_space<vmem>>, vector<16x1xf32>
      tpu.vector_store %arg6[%c0_30, %c0_31], %45 {strides = array<i32>} : memref<16x1xf32, #tpu.memory_space<vmem>>, vector<16x1xf32>,
      %cst_32 = arith.constant 0.000000e+00 : f32
      %47 = vector.broadcast %cst_32 : f32 to vector<16x1xf32>
      %c0_33 = arith.constant 0 : index
      %c0_34 = arith.constant 0 : index
      %48 = vector.load %arg7[%c0_33, %c0_34] : memref<16x1xf32, #tpu.memory_space<vmem>>, vector<16x1xf32>
      tpu.vector_store %arg7[%c0_33, %c0_34], %47 {strides = array<i32>} : memref<16x1xf32, #tpu.memory_space<vmem>>, vector<16x1xf32>,
      %cst_35 = arith.constant 0.000000e+00 : f32
      %49 = vector.broadcast %cst_35 : f32 to vector<16x1xf32>
      %c0_36 = arith.constant 0 : index
      %c0_37 = arith.constant 0 : index
      %50 = vector.load %arg8[%c0_36, %c0_37] : memref<16x1xf32, #tpu.memory_space<vmem>>, vector<16x1xf32>
      tpu.vector_store %arg8[%c0_36, %c0_37], %49 {strides = array<i32>} : memref<16x1xf32, #tpu.memory_space<vmem>>, vector<16x1xf32>,
    } else {
    }
    %c0 = arith.constant 0 : index
    %c0_1 = arith.constant 0 : index
    %3 = vector.load %arg2[%c0, %c0_1] : memref<16x32xbf16, #tpu.memory_space<vmem>>, vector<16x32xbf16>
    %4 = arith.extf %3 : vector<16x32xbf16> to vector<16x32xf32>
    %5 = tpu.iota {dimensions = array<i32: 1>} : vector<16x32xi32>
    %c32_i32 = arith.constant 32 : i32
    %6 = arith.muli %arg1, %c32_i32 : i32
    %7 = vector.broadcast %6 : i32 to vector<16x32xi32>
    %8 = arith.addi %5, %7 : vector<16x32xi32>
    %c0_2 = arith.constant 0 : index
    %c0_3 = arith.constant 0 : index
    %9 = vector.load %arg5[%c0_2, %c0_3] : memref<16x1xf32, #tpu.memory_space<vmem>>, vector<16x1xf32>
    %cst = arith.constant dense<0xFF800000> : vector<16xf32>
    %10 = vector.multi_reduction <maximumf>, %4, %cst [1] : vector<16x32xf32> to vector<16xf32>
    %11 = vector.shape_cast %10 : vector<16xf32> to vector<16x1xf32>
    %12 = arith.maximumf %9, %11 : vector<16x1xf32>
    %13 = vector.broadcast %12 : vector<16x1xf32> to vector<16x32xf32>
    %14 = arith.subf %4, %13 : vector<16x32xf32>
    %15 = math.exp %14 : vector<16x32xf32>
    %c0_4 = arith.constant 0 : index
    %c0_5 = arith.constant 0 : index
    %16 = vector.load %arg6[%c0_4, %c0_5] : memref<16x1xf32, #tpu.memory_space<vmem>>, vector<16x1xf32>
    %17 = arith.subf %9, %12 : vector<16x1xf32>
    %18 = math.exp %17 : vector<16x1xf32>
    %19 = arith.mulf %16, %18 : vector<16x1xf32>
    %cst_6 = arith.constant dense<0.000000e+00> : vector<16xf32>
    %20 = vector.multi_reduction <add>, %15, %cst_6 [1] : vector<16x32xf32> to vector<16xf32>
    %21 = vector.shape_cast %20 : vector<16xf32> to vector<16x1xf32>
    %22 = arith.addf %19, %21 : vector<16x1xf32>
    %c0_7 = arith.constant 0 : index
    %c0_8 = arith.constant 0 : index
    %23 = vector.load %arg6[%c0_7, %c0_8] : memref<16x1xf32, #tpu.memory_space<vmem>>, vector<16x1xf32>
    tpu.vector_store %arg6[%c0_7, %c0_8], %22 {strides = array<i32>} : memref<16x1xf32, #tpu.memory_space<vmem>>, vector<16x1xf32>,
    %c0_9 = arith.constant 0 : index
    %c0_10 = arith.constant 0 : index
    %24 = vector.load %arg5[%c0_9, %c0_10] : memref<16x1xf32, #tpu.memory_space<vmem>>, vector<16x1xf32>
    tpu.vector_store %arg5[%c0_9, %c0_10], %12 {strides = array<i32>} : memref<16x1xf32, #tpu.memory_space<vmem>>, vector<16x1xf32>,
    %c0_11 = arith.constant 0 : index
    %c0_12 = arith.constant 0 : index
    %25 = vector.load %arg7[%c0_11, %c0_12] : memref<16x1xf32, #tpu.memory_space<vmem>>, vector<16x1xf32>
    %cst_13 = arith.constant dense<0.000000e+00> : vector<16xf32>
    %26 = vector.multi_reduction <add>, %4, %cst_13 [1] : vector<16x32xf32> to vector<16xf32>
    %27 = vector.shape_cast %26 : vector<16xf32> to vector<16x1xf32>
    %28 = arith.addf %25, %27 : vector<16x1xf32>
    %c0_14 = arith.constant 0 : index
    %c0_15 = arith.constant 0 : index
    %29 = vector.load %arg7[%c0_14, %c0_15] : memref<16x1xf32, #tpu.memory_space<vmem>>, vector<16x1xf32>
    tpu.vector_store %arg7[%c0_14, %c0_15], %28 {strides = array<i32>} : memref<16x1xf32, #tpu.memory_space<vmem>>, vector<16x1xf32>,
    %c0_16 = arith.constant 0 : index
    %c0_17 = arith.constant 0 : index
    %30 = vector.load %arg3[%c0_16, %c0_17] : memref<16x1xi32, #tpu.memory_space<vmem>>, vector<16x1xi32>
    %31 = vector.broadcast %30 : vector<16x1xi32> to vector<16x32xi32>
    %32 = arith.cmpi eq, %8, %31 : vector<16x32xi32>
    %cst_18 = arith.constant 0.000000e+00 : f32
    %33 = vector.broadcast %cst_18 : f32 to vector<16x32xf32>
    %34 = arith.select %32, %4, %33 : vector<16x32xi1>, vector<16x32xf32>
    %c0_19 = arith.constant 0 : index
    %c0_20 = arith.constant 0 : index
    %35 = vector.load %arg8[%c0_19, %c0_20] : memref<16x1xf32, #tpu.memory_space<vmem>>, vector<16x1xf32>
    %cst_21 = arith.constant dense<0.000000e+00> : vector<16xf32>
    %36 = vector.multi_reduction <add>, %34, %cst_21 [1] : vector<16x32xf32> to vector<16xf32>
    %37 = vector.shape_cast %36 : vector<16xf32> to vector<16x1xf32>
    %38 = arith.addf %35, %37 : vector<16x1xf32>
    %c0_22 = arith.constant 0 : index
    %c0_23 = arith.constant 0 : index
    %39 = vector.load %arg8[%c0_22, %c0_23] : memref<16x1xf32, #tpu.memory_space<vmem>>, vector<16x1xf32>
    tpu.vector_store %arg8[%c0_22, %c0_23], %38 {strides = array<i32>} : memref<16x1xf32, #tpu.memory_space<vmem>>, vector<16x1xf32>,
    %c0_i32_24 = arith.constant 0 : i32
    %40 = arith.cmpi eq, %arg1, %c0_i32_24 : i32
    %41 = arith.extui %40 : i1 to i32
    %c0_i32_25 = arith.constant 0 : i32
    %42 = arith.cmpi ne, %41, %c0_i32_25 : i32
    scf.if %42 {
      %c0_26 = arith.constant 0 : index
      %c0_27 = arith.constant 0 : index
      %43 = vector.load %arg5[%c0_26, %c0_27] : memref<16x1xf32, #tpu.memory_space<vmem>>, vector<16x1xf32>
      %c0_28 = arith.constant 0 : index
      %c0_29 = arith.constant 0 : index
      %44 = vector.load %arg6[%c0_28, %c0_29] : memref<16x1xf32, #tpu.memory_space<vmem>>, vector<16x1xf32>
      %45 = math.log %44 : vector<16x1xf32>
      %46 = arith.addf %43, %45 : vector<16x1xf32>
      %c0_30 = arith.constant 0 : index
      %c0_31 = arith.constant 0 : index
      %47 = vector.load %arg8[%c0_30, %c0_31] : memref<16x1xf32, #tpu.memory_space<vmem>>, vector<16x1xf32>
      %cst_32 = arith.constant 0.899999976 : f32
      %48 = vector.broadcast %cst_32 : f32 to vector<16x1xf32>
      %49 = arith.mulf %48, %47 : vector<16x1xf32>
      %50 = arith.subf %46, %49 : vector<16x1xf32>
      %c0_33 = arith.constant 0 : index
      %c0_34 = arith.constant 0 : index
      %51 = vector.load %arg7[%c0_33, %c0_34] : memref<16x1xf32, #tpu.memory_space<vmem>>, vector<16x1xf32>
      %cst_35 = arith.constant 3.125000e-03 : f32
      %52 = vector.broadcast %cst_35 : f32 to vector<16x1xf32>
      %53 = arith.mulf %52, %51 : vector<16x1xf32>
      %54 = arith.subf %50, %53 : vector<16x1xf32>
      %c0_36 = arith.constant 0 : index
      %c0_37 = arith.constant 0 : index
      %55 = vector.load %arg4[%c0_36, %c0_37] : memref<16x1xf32, #tpu.memory_space<vmem>>, vector<16x1xf32>
      tpu.vector_store %arg4[%c0_36, %c0_37], %54 {strides = array<i32>} : memref<16x1xf32, #tpu.memory_space<vmem>>, vector<16x1xf32>,
    } else {
    }
    return
  }
  func.func @transform_0(%arg0: i32, %arg1: i32) -> (i32, i32) {
    %c0_i32 = arith.constant 0 : i32
    return %arg0, %arg1 : i32, i32
  }
  func.func @transform_1(%arg0: i32, %arg1: i32) -> (i32, i32) {
    %c0_i32 = arith.constant 0 : i32
    %c0_i32_0 = arith.constant 0 : i32
    return %arg0, %c0_i32 : i32, i32
  }
  func.func @transform_2(%arg0: i32, %arg1: i32) -> (i32, i32) {
    %c0_i32 = arith.constant 0 : i32
    %c0_i32_0 = arith.constant 0 : i32
    return %arg0, %c0_i32 : i32, i32
  }
}

</mosaic_0001>

<bundles_post_ra>
// kernel: tpu_custom_call.1
= control target key start
LH: loop header
LB: loop body
LE: loop exit
PB: predicated region body
PF: predicated region fallthrough
CT: control target
= control target key end

     0   :  { %vm15_vm0 = vcmask 7168   ;;  %vm35_vm1 = vcmask 261120   ;;  %v171_v1 = vmov -inf   ;;  %v172_v6 = vmov 0   ;;  %s230_s0 = inlined_call_operand.vmem [shape: bf16[16,32], index: 0, kind: input, shape index: {}]   ;;  %s231_s1 = inlined_call_operand.vmem [shape: s32[16,1], index: 1, kind: input, shape index: {}]   ;;  %s232_s2 = inlined_call_operand.vmem [shape: f32[16,1], index: 2, kind: output, shape index: {}]  }
   0x1   :  { %v151_v0 = vld [vmem:[%s230_s0] sm:$0xff]   ;;  %16 = vst.msk [vmem:[#allocation2] sm:$0xff] %vm15_vm0, %v171_v1  ;;  %17 = vst.msk [vmem:[#allocation2 + $0x8] sm:$0xff] %vm15_vm0, %v171_v1  ;;  %157 = vset.pattern.permute.xlu1 %v172_v6  ;;  %158 = vset.pattern.permute.xlu0 %v172_v6  ;;  %v173_v7 = vmov 0.0   ;;  %v96_v17 = vld [vmem:[%s231_s1 + $0x8] sm:$0xff]  ;;  %v28_v18 = vlaneseq }
   0x2   :  { %v152_v2 = vunpack.c.l.bf16 %v151_v0  ;;  %v153_v3 = vunpack.c.h.bf16 %v151_v0  ;;  %18 = vst.msk [vmem:[#allocation3] sm:$0xff] %vm15_vm0, %v173_v7  ;;  %19 = vst.msk [vmem:[#allocation3 + $0x8] sm:$0xff] %vm15_vm0, %v173_v7  ;;  %v95_v8 = vld [vmem:[%s231_s1] sm:$0xff] }
   0x3   :  { %20 = vst.msk [vmem:[#allocation4] sm:$0xff] %vm15_vm0, %v173_v7  ;;  %21 = vst.msk [vmem:[#allocation4 + $0x8] sm:$0xff] %vm15_vm0, %v173_v7  ;;  %v29_v19 = vand.u32 127, %v28_v18 }
   0x4   :  { %v36_v4 = vsel %vm35_vm1, %v152_v2, -inf  ;;  %v39_v5 = vsel %vm35_vm1, %v153_v3, -inf  ;;  %22 = vst.msk [vmem:[#allocation5] sm:$0xff] %vm15_vm0, %v173_v7  ;;  %23 = vst.msk [vmem:[#allocation5 + $0x8] sm:$0xff] %vm15_vm0, %v173_v7  ;;  %v85_v36 = vsel %vm35_vm1, %v152_v2, 0.0  ;;  %v88_v37 = vsel %vm35_vm1, %v153_v3, 0.0 }
   0x5   :  { %37 = vmax.xlane.f32.xlu0 %v36_v4 }
   0x8   :  { %v33_v9 = vld [vmem:[#allocation2] sm:$0xff]  ;;  %v34_v12 = vld [vmem:[#allocation2 + $0x8] sm:$0xff] }
   0x9   :  { %40 = vmax.xlane.f32.xlu0 %v39_v5  ;;  %v60_v44 = vld [vmem:[#allocation3] sm:$0xff]  ;;  %v61_v48 = vld [vmem:[#allocation3 + $0x8] sm:$0xff] }
   0xa   :  { %v83_v57 = vld [vmem:[#allocation4] sm:$0xff]  ;;  %v84_v61 = vld [vmem:[#allocation4 + $0x8] sm:$0xff] }
   0xb   :  { %v107_v38 = vld [vmem:[#allocation5] sm:$0xff]  ;;  %v108_v53 = vld [vmem:[#allocation5 + $0x8] sm:$0xff] }
  0x1f   :  { %98 = vperm.xlu0 %158, %v95_v8  }
  0x92   :  { %v38_v10 = vpop.xlane.xlu0 %37 }
  0x93   :  { %v42_v11 = vmax.f32 %v33_v9, %v38_v10 }
  0x95   :  { %v62_v13 = vsub.f32 %v33_v9, %v42_v11  ;;  %81 = vst.msk [vmem:[#allocation2] sm:$0xff] %vm15_vm0, %v42_v11  ;;  %46 = vperm.xlu1 %157, %v42_v11  }
  0x96   :  { %v41_v14 = vpop.xlane.xlu0 %40 }
  0x97   :  { %v43_v15 = vmax.f32 %v34_v12, %v41_v14  ;;  %v64_v41 = vmul.f32 1.442695, %v62_v13 }
  0x99   :  { %v63_v16 = vsub.f32 %v34_v12, %v43_v15  ;;  %82 = vst.msk [vmem:[#allocation2 + $0x8] sm:$0xff] %vm15_vm0, %v43_v15  ;;  %51 = vperm.xlu1 %157, %v43_v15  }
  0x9b   :  { %v66_v42 = vmul.f32 1.442695, %v63_v16 }
  0x9c   :  { %v122_v5 = vld [vmem:[#allocation2] sm:$0xff] }
  0x9d   :  { %101 = vperm.xlu1 %157, %v96_v17  }
  0x9e   :  { %v99_v20 = vpop.permute.xlu0 %98 }
  0x9f   :  { %vm103_vm2 = vcmp.eq.s32.totalorder %v29_v19, %v99_v20 }
  0xa0   :  { %v105_v21 = vsel %vm103_vm2, %v152_v2, 0.0  ;;  %v123_v13 = vld [vmem:[#allocation2 + $0x8] sm:$0xff] }
  0xa1   :  { %v109_v22 = vsel %vm35_vm1, %v105_v21, 0.0 }
  0xa2   :  { %110 = vadd.xlane.f32.xlu0 %v109_v22 }
 0x114   :  { %v47_v23 = vpop.permute.xlu1 %46 }
 0x115   :  { %v54_v24 = vsub.f32 %v152_v2, %v47_v23 }
 0x117   :  { %v56_v25 = vmul.f32 1.442695, %v54_v24 }
 0x118   :  { %v52_v26 = vpop.permute.xlu1 %51 }
 0x119   :  { %159 = vpow2.f32 %v56_v25  ;;  %v55_v27 = vsub.f32 %v153_v3, %v52_v26 }
 0x11b   :  { %v58_v28 = vmul.f32 1.442695, %v55_v27 }
 0x11c   :  { %v102_v30 = vpop.permute.xlu1 %101 }
 0x11d   :  { %161 = vpow2.f32 %v58_v28  ;;  %vm104_vm3 = vcmp.eq.s32.totalorder %v29_v19, %v102_v30 }
 0x11e   :  { %v106_v34 = vsel %vm104_vm3, %v153_v3, 0.0  ;;  %163 = vpow2.f32 %v64_v41 }
 0x11f   :  { %v112_v35 = vsel %vm35_vm1, %v106_v34, 0.0  ;;  %165 = vpow2.f32 %v66_v42 }
 0x123   :  { %v160_v29 = vpop.eup %159 }
 0x124   :  { %v70_v31 = vsel %vm35_vm1, %v160_v29, 0.0 }
 0x125   :  { %71 = vadd.xlane.f32.xlu1 %v70_v31 }
 0x127   :  { %v162_v32 = vpop.eup %161 }
 0x128   :  { %v73_v33 = vsel %vm35_vm1, %v162_v32, 0.0  ;;  %v164_v43 = vpop.eup %163 }
 0x129   :  { %74 = vadd.xlane.f32.xlu1 %v73_v33  ;;  %v68_v45 = vmul.f32 %v164_v43, %v60_v44  ;;  %v166_v46 = vpop.eup %165 }
 0x12a   :  { %v69_v50 = vmul.f32 %v166_v46, %v61_v48 }
 0x12d   :  { %113 = vadd.xlane.f32.xlu1 %v112_v35 }
 0x12f   :  { %v111_v39 = vpop.xlane.xlu0 %110 }
 0x130   :  { %v115_v40 = vadd.f32 %v111_v39, %v107_v38 }
 0x131   :  { %86 = vadd.xlane.f32.xlu1 %v85_v36 }
 0x132   :  { %117 = vst.msk [vmem:[#allocation5] sm:$0xff] %vm15_vm0, %v115_v40 }
 0x135   :  { %89 = vadd.xlane.f32.xlu1 %v88_v37 }
 0x139   :  { %v132_v0 = vld [vmem:[#allocation5] sm:$0xff] }
 0x13a   :  { %v134_v3 = vmul.f32 0.9, %v132_v0 }
 0x1b2   :  { %v72_v47 = vpop.xlane.xlu1 %71 }
 0x1b3   :  { %v76_v49 = vadd.f32 %v72_v47, %v68_v45 }
 0x1b5   :  { %79 = vst.msk [vmem:[#allocation3] sm:$0xff] %vm15_vm0, %v76_v49 }
 0x1b6   :  { %v75_v51 = vpop.xlane.xlu1 %74 }
 0x1b7   :  { %v77_v52 = vadd.f32 %v75_v51, %v69_v50 }
 0x1b9   :  { %80 = vst.msk [vmem:[#allocation3 + $0x8] sm:$0xff] %vm15_vm0, %v77_v52 }
 0x1ba   :  { %v114_v54 = vpop.xlane.xlu1 %113 }
 0x1bb   :  { %v116_v55 = vadd.f32 %v114_v54, %v108_v53 }
 0x1bc   :  { %v124_v56 = vld [vmem:[#allocation3] sm:$0xff] }
 0x1bd   :  { %167 = vlog2.f32 %v124_v56  ;;  %118 = vst.msk [vmem:[#allocation5 + $0x8] sm:$0xff] %vm15_vm0, %v116_v55 }
 0x1be   :  { %v87_v58 = vpop.xlane.xlu1 %86 }
 0x1bf   :  { %v91_v59 = vadd.f32 %v87_v58, %v83_v57 }
 0x1c0   :  { %v125_v60 = vld [vmem:[#allocation3 + $0x8] sm:$0xff] }
 0x1c1   :  { %169 = vlog2.f32 %v125_v60  ;;  %93 = vst.msk [vmem:[#allocation4] sm:$0xff] %vm15_vm0, %v91_v59 }
 0x1c2   :  { %v90_v62 = vpop.xlane.xlu1 %89 }
 0x1c3   :  { %v92_v63 = vadd.f32 %v90_v62, %v84_v61 }
 0x1c4   :  { %v133_v9 = vld [vmem:[#allocation5 + $0x8] sm:$0xff] }
 0x1c5   :  { %94 = vst.msk [vmem:[#allocation4 + $0x8] sm:$0xff] %vm15_vm0, %v92_v63  ;;  %v135_v15 = vmul.f32 0.9, %v133_v9 }
 0x1c7   :  { %v168_v1 = vpop.eup %167 }
 0x1c8   :  { %v127_v2 = vmul.f32 0.6931472, %v168_v1  ;;  %v138_v4 = vld [vmem:[#allocation4] sm:$0xff] }
 0x1c9   :  { %v140_v7 = vmul.f32 0.003125, %v138_v4 }
 0x1ca   :  { %v130_v6 = vadd.f32 %v127_v2, %v122_v5 }
 0x1cb   :  { %v170_v8 = vpop.eup %169 }
 0x1cc   :  { %v129_v10 = vmul.f32 0.6931472, %v170_v8  ;;  %v136_v11 = vsub.f32 %v130_v6, %v134_v3  ;;  %v139_v12 = vld [vmem:[#allocation4 + $0x8] sm:$0xff] }
 0x1cd   :  { %v141_v17 = vmul.f32 0.003125, %v139_v12 }
 0x1ce   :  { %v131_v14 = vadd.f32 %v129_v10, %v123_v13  ;;  %v142_v16 = vsub.f32 %v136_v11, %v140_v7 }
 0x1d0   :  { %v137_v18 = vsub.f32 %v131_v14, %v135_v15  ;;  %144 = vst.msk [vmem:[%s232_s2] sm:$0xff] %vm15_vm0, %v142_v16 }
 0x1d2   :  { %v143_v19 = vsub.f32 %v137_v18, %v141_v17 }
 0x1d4   :  { %145 = vst.msk [vmem:[%s232_s2 + $0x8] sm:$0xff] %vm15_vm0, %v143_v19 }

</bundles_post_ra>
